<compile_context>
chip_gen: v7x
topology: tpu7x:2x2x1
jax: 0.10.0
libtpu: 0.0.40
codegen_flags: <defaults>
</compile_context>

<pallas_src>
import functools

import jax
import jax.numpy as jnp
from jax.experimental import pallas as pl
from jax.experimental.pallas import tpu as pltpu

_LANE = 128


def _round_up(a, b):
    return pl.cdiv(a, b) * b


def _chip_info():
    """Returns (vmem_capacity_bytes, assumed TensorCores per chip)."""
    try:
        vmem = int(pltpu.get_tpu_info().vmem_capacity_bytes)
    except Exception:
        vmem = 64 << 20  # conservative (v7x-sized VMEM) if the query fails
    # Heuristic: 64 MiB/core VMEM chips (v7x) have 2 TensorCores that share the
    # grid via dimension_semantics="parallel"; 128 MiB chips (v5e/v6e) have 1.
    cores = 2 if vmem <= (64 << 20) else 1
    return vmem, cores


def _pooled_sum_f32(x_ref, max_widened_bytes=4 << 20):
    """Sum x_ref over its last (spatial) axis with f32 accumulation.

    For non-f32 inputs the cast is done chunk-by-chunk over static,
    128-aligned lane slices, so no widened f32 copy of the whole tile is ever
    materialized (saves VMEM/vregs for bf16 activations, esp. on v5e).
    """
    Bt, C, S = x_ref.shape
    widened = Bt * C * S * 4
    if x_ref.dtype == jnp.float32 or widened <= max_widened_bytes:
        return jnp.sum(x_ref[...].astype(jnp.float32), axis=-1)
    n_chunks = min(8, pl.cdiv(widened, max_widened_bytes))
    chunk = _LANE * pl.cdiv(pl.cdiv(S, n_chunks), _LANE)
    acc = jnp.zeros((Bt, C), jnp.float32)
    start = 0
    while start < S:  # static (trace-time) loop, static 128-aligned slices
        size = min(chunk, S - start)
        acc = acc + jnp.sum(
            x_ref[:, :, start:start + size].astype(jnp.float32), axis=-1)
        start += size
    return acc


# ----------------------------- fused single pass ----------------------------


def _se_kernel(x_ref, w1_ref, w2_ref, o_ref, *, inv_s):
    # x_ref: (Bt, C, S), w1_ref: (C_r, C), w2_ref: (C, C_r), o_ref: (Bt, C, S)

    # 1) squeeze: f32-accumulated global average pool over spatial.
    y = _pooled_sum_f32(x_ref) * inv_s                        # (Bt, C) f32

    # 2) excitation MLP: Linear(C -> C_r) + ReLU.  Activations are cast to the
    #    (VMEM-resident) weight dtype so bf16 weights stay on the native bf16
    #    MXU path; accumulation is f32 via preferred_element_type.
    h = jnp.einsum("bc,rc->br", y.astype(w1_ref.dtype), w1_ref[...],
                   preferred_element_type=jnp.float32)        # (Bt, C_r)
    h = jnp.maximum(h, 0.0)

    # 3) Linear(C_r -> C) + Sigmoid
    s = jnp.einsum("br,cr->bc", h.astype(w2_ref.dtype), w2_ref[...],
                   preferred_element_type=jnp.float32)        # (Bt, C)
    s = jax.nn.sigmoid(s)

    # 4) scale: broadcast the gate over spatial, store at the input dtype.
    gate = s.astype(x_ref.dtype)[:, :, None]                  # (Bt, C, 1)
    o_ref[...] = (x_ref[...] * gate).astype(o_ref.dtype)


# ------------------------- two-pass fallback (huge S) ------------------------


def _pool_kernel(x_ref, ysum_ref, *, s_total, s_tile):
    si = pl.program_id(1)

    @pl.when(si == 0)
    def _():
        ysum_ref[...] = jnp.zeros_like(ysum_ref)

    xb = x_ref[...].astype(jnp.float32)                       # (1, C, St)
    if s_total % s_tile != 0:
        # The last spatial tile is a partial block whose padding is
        # unspecified: mask it out before accumulating.
        lane = jax.lax.broadcasted_iota(jnp.int32, xb.shape, 2)
        valid = s_total - si * s_tile
        xb = jnp.where(lane < valid, xb, 0.0)
    ysum_ref[...] += jnp.sum(xb, axis=-1, keepdims=True)      # (1, C, 1)


def _scale_kernel(x_ref, g_ref, o_ref):
    # x_ref: (1, C, St), g_ref: (1, C, 1)
    o_ref[...] = (x_ref[...] * g_ref[...].astype(x_ref.dtype)).astype(o_ref.dtype)


def _se_layer_two_pass(x3, w1, w2, inv_s, block_budget, vmem_cap):
    """Spatial-tiled fallback for shapes where one batch row exceeds the block
    budget (e.g. NCDHW / very large S on v7x's 64 MiB VMEM).  Costs one extra
    read of x (3N vs 2N bytes) but stays pipelined and VMEM-bounded."""
    B, C, S = (int(d) for d in x3.shape)
    dtype = x3.dtype
    itemsize = jnp.dtype(dtype).itemsize
    c_pad = _round_up(C, 8)

    # Spatial tile sized so the f32-widened pooled chunk also fits the budget.
    lanes = max(_LANE, (block_budget // (c_pad * 4)) // _LANE * _LANE)
    s_tile = min(lanes, _round_up(S, _LANE))
    if s_tile >= S:
        s_tile = S  # full-dim block: internal lane padding handled by Mosaic

    grid = (B, pl.cdiv(S, s_tile))
    tile_bytes = c_pad * _round_up(s_tile, _LANE) * itemsize
    vmem_bytes = int(min(
        vmem_cap - (8 << 20),
        max(6 * tile_bytes + c_pad * _round_up(s_tile, _LANE) * 4 + (8 << 20),
            32 << 20)))

    # Pass 1: global sum-pool, f32-accumulated across spatial tiles.
    ysum = pl.pallas_call(
        functools.partial(_pool_kernel, s_total=S, s_tile=s_tile),
        out_shape=jax.ShapeDtypeStruct((B, C, 1), jnp.float32),
        grid_spec=pltpu.PrefetchScalarGridSpec(
            num_scalar_prefetch=0,
            grid=grid,
            in_specs=[pl.BlockSpec((1, C, s_tile), lambda b, s: (b, 0, s))],
            out_specs=pl.BlockSpec((1, C, 1), lambda b, s: (b, 0, 0)),
        ),
        compiler_params=pltpu.CompilerParams(
            dimension_semantics=("parallel", "arbitrary"),
            vmem_limit_bytes=vmem_bytes,
        ),
        cost_estimate=pl.CostEstimate(
            flops=int(B * C * S), transcendentals=0,
            bytes_accessed=int(B * C * S * itemsize + B * C * 4)),
    )(x3)

    # Tiny excitation MLP on (B, C) in plain XLA (negligible vs HBM traffic).
    y = ysum[:, :, 0] * inv_s
    h = jnp.maximum(
        jnp.dot(y.astype(w1.dtype), w1.T, preferred_element_type=jnp.float32,
                precision=jax.lax.Precision.HIGHEST), 0.0)
    gate = jax.nn.sigmoid(
        jnp.dot(h.astype(w2.dtype), w2.T, preferred_element_type=jnp.float32,
                precision=jax.lax.Precision.HIGHEST))
    gate3 = gate.astype(dtype).reshape(B, C, 1)

    # Pass 2: out = x * gate, broadcast over the spatial tiles.
    out3 = pl.pallas_call(
        _scale_kernel,
        out_shape=jax.ShapeDtypeStruct((B, C, S), dtype),
        grid_spec=pltpu.PrefetchScalarGridSpec(
            num_scalar_prefetch=0,
            grid=grid,
            in_specs=[
                pl.BlockSpec((1, C, s_tile), lambda b, s: (b, 0, s)),
                pl.BlockSpec((1, C, 1), lambda b, s: (b, 0, 0)),
            ],
            out_specs=pl.BlockSpec((1, C, s_tile), lambda b, s: (b, 0, s)),
        ),
        compiler_params=pltpu.CompilerParams(
            dimension_semantics=("parallel", "parallel"),
            vmem_limit_bytes=vmem_bytes,
        ),
        cost_estimate=pl.CostEstimate(
            flops=int(B * C * S), transcendentals=0,
            bytes_accessed=int(2 * B * C * S * itemsize + B * C * itemsize)),
    )(x3, gate3)
    return out3


# ---------------------------------- wrapper ----------------------------------


def se_layer(x, w1, w2, *, max_block_bytes=None):
    """SELayer forward.  x: (B, C, *spatial); w1: (C//r, C); w2: (C, C//r)."""
    B, C = int(x.shape[0]), int(x.shape[1])
    spatial = x.shape[2:]
    S = 1
    for d in spatial:
        S *= int(d)
    C_r = int(w1.shape[0])
    dtype = x.dtype
    itemsize = jnp.dtype(dtype).itemsize
    w_itemsize = jnp.dtype(w1.dtype).itemsize
    inv_s = 1.0 / float(S)

    # Free (metadata-only) reshape; no pads, no trailing slice.
    x3 = x.reshape(B, C, S)

    vmem_cap, n_cores = _chip_info()
    weight_bytes = (w1.size + w2.size) * w_itemsize

    # Block budget: (in + out) double buffering => ~4 live copies of the block,
    # plus weights and compiler scratch, inside ~3/4 of physical VMEM
    # (~23 MiB blocks on v5e/v6e, ~11 MiB on v7x).
    usable = (vmem_cap * 3) // 4
    block_budget = max((usable - 4 * weight_bytes - (4 << 20)) // 4, 1 << 20)
    if max_block_bytes is not None:
        block_budget = int(max_block_bytes)

    # Physical VMEM footprint of one batch row of the (Bt, C, S) block.
    sub = max(8, 32 // itemsize)
    row_bytes = _round_up(C, sub) * _round_up(S, _LANE) * itemsize

    if row_bytes > block_budget:
        # One batch row doesn't fit: spatial-tiled two-pass fallback.
        out3 = _se_layer_two_pass(x3, w1, w2, inv_s, block_budget, vmem_cap)
        return out3.reshape(x.shape)

    # Batch tile: biggest that fits the budget; on 2-TensorCore chips keep at
    # least 2 grid steps (when B >= 2) so megacore sharding has work to split.
    Bt = min(B, max(1, block_budget // row_bytes))
    if n_cores >= 2 and B >= 2:
        Bt = min(Bt, pl.cdiv(B, 2))
    Bt = int(Bt)

    grid = (pl.cdiv(B, Bt),)  # ragged last block handled by Pallas masking

    block_bytes = Bt * row_bytes
    vmem_bytes = int(min(
        vmem_cap - (8 << 20),
        max(4 * block_bytes + 4 * weight_bytes + (8 << 20), 32 << 20)))

    cost = pl.CostEstimate(
        flops=int(2 * B * C * S + 4 * B * C * C_r + B * C * S),
        transcendentals=int(B * C),
        bytes_accessed=int(2 * B * C * S * itemsize + weight_bytes),
    )

    # TODO(synk): if a trace shows exposed DMA on v7x, consider
    # pipeline_mode=pl.Buffered(3) on the x BlockSpec (costs +1 block of VMEM).
    out3 = pl.pallas_call(
        functools.partial(_se_kernel, inv_s=inv_s),
        out_shape=jax.ShapeDtypeStruct((B, C, S), dtype),
        grid_spec=pltpu.PrefetchScalarGridSpec(
            num_scalar_prefetch=0,
            grid=grid,
            in_specs=[
                pl.BlockSpec((Bt, C, S), lambda b: (b, 0, 0)),
                pl.BlockSpec((C_r, C), lambda b: (0, 0)),
                pl.BlockSpec((C, C_r), lambda b: (0, 0)),
            ],
            out_specs=pl.BlockSpec((Bt, C, S), lambda b: (b, 0, 0)),
        ),
        compiler_params=pltpu.CompilerParams(
            dimension_semantics=("parallel",),
            vmem_limit_bytes=vmem_bytes,
        ),
        cost_estimate=cost,
    )(x3, w1, w2)

    return out3.reshape(x.shape)


# --------------------------------- reference ---------------------------------


def se_layer_ref(x, w1, w2):
    """Pure-JAX f32 reference mirroring the PyTorch forward."""
    xf = x.astype(jnp.float32)
    w1f = w1.astype(jnp.float32)
    w2f = w2.astype(jnp.float32)
    axes = tuple(range(2, x.ndim))
    y = jnp.mean(xf, axis=axes)                                     # (B, C)
    h = jnp.maximum(
        jnp.dot(y, w1f.T, precision=jax.lax.Precision.HIGHEST), 0.0)
    s = jax.nn.sigmoid(
        jnp.dot(h, w2f.T, precision=jax.lax.Precision.HIGHEST))
    return xf * s.reshape(s.shape + (1,) * (x.ndim - 2))


# ----------------------------------- tests -----------------------------------


if __name__ == "__main__":
    def make_case(key, shape, reduction, dtype):
        C = shape[1]
        C_r = max(1, C // reduction)
        kx, k1, k2 = jax.random.split(key, 3)
        x = jax.random.normal(kx, shape, dtype=jnp.float32).astype(dtype)
        w1 = (jax.random.normal(k1, (C_r, C), jnp.float32) * (C ** -0.5)).astype(dtype)
        w2 = (jax.random.normal(k2, (C, C_r), jnp.float32) * (C_r ** -0.5)).astype(dtype)
        return x, w1, w2

    key = jax.random.PRNGKey(0)
    k1, k2, k3 = jax.random.split(key, 3)

    # 1) NCHW f32, lane-aligned spatial: fused single-pass path.
    x, w1, w2 = make_case(k1, (2, 64, 16, 16), 16, jnp.float32)
    out = jax.block_until_ready(se_layer(x, w1, w2))
    ref = se_layer_ref(x, w1, w2)
    assert out.shape == x.shape and out.dtype == x.dtype
    assert jnp.allclose(out.astype(jnp.float32), ref, atol=1e-4, rtol=1e-4), \
        "mismatch vs reference (f32 NCHW)"

    # 2) NCDHW bf16: ragged spatial (S=500) and ragged batch grid (Bt=2 of B=3),
    #    exercising Pallas partial-block masking with no wrapper pad/slice.
    x, w1, w2 = make_case(k2, (3, 32, 5, 10, 10), 16, jnp.bfloat16)
    out = jax.block_until_ready(se_layer(x, w1, w2, max_block_bytes=70 * 1024))
    ref = se_layer_ref(x, w1, w2)
    assert out.shape == x.shape and out.dtype == x.dtype
    assert jnp.allclose(out.astype(jnp.float32), ref, atol=5e-2, rtol=5e-2), \
        "mismatch vs reference (bf16 NCDHW)"

    # 3) Forced two-pass fallback (single batch row over the block budget),
    #    exercising the spatially tiled pool with a masked partial S tile.
    x, w1, w2 = make_case(k3, (2, 32, 5, 6, 6), 8, jnp.float32)
    out = jax.block_until_ready(se_layer(x, w1, w2, max_block_bytes=16 * 1024))
    ref = se_layer_ref(x, w1, w2)
    assert out.shape == x.shape and out.dtype == x.dtype
    assert jnp.allclose(out.astype(jnp.float32), ref, atol=1e-4, rtol=1e-4), \
        "mismatch vs reference (two-pass fallback)"

    print("KERNEL_OK")
</pallas_src>

<mosaic_0001>
module attributes {stable_mosaic.version = 11 : i64} {
  func.func @_se_kernel(%arg0: i32, %arg1: memref<1x64x256xf32, #tpu.memory_space<vmem>>, %arg2: memref<4x64xf32, #tpu.memory_space<vmem>>, %arg3: memref<64x4xf32, #tpu.memory_space<vmem>>, %arg4: memref<1x64x256xf32, #tpu.memory_space<vmem>>) attributes {dimension_semantics = [#tpu.dimension_semantics<parallel>], iteration_bounds = array<i64: 2>, scalar_prefetch = 0 : i64, scratch_operands = 0 : i64, tpu.core_type = #tpu.core_type<tc>, window_params = [{transform_indices = @transform_0, window_bounds = array<i64: 1, 64, 256>}, {pipeline_mode = #tpu.pipeline_mode<synchronous>, transform_indices = @transform_1, window_bounds = array<i64: 4, 64>}, {pipeline_mode = #tpu.pipeline_mode<synchronous>, transform_indices = @transform_2, window_bounds = array<i64: 64, 4>}, {transform_indices = @transform_3, window_bounds = array<i64: 1, 64, 256>}]} {
    %c0 = arith.constant 0 : index
    %c0_0 = arith.constant 0 : index
    %c0_1 = arith.constant 0 : index
    %0 = vector.load %arg1[%c0, %c0_0, %c0_1] : memref<1x64x256xf32, #tpu.memory_space<vmem>>, vector<1x64x256xf32>
    %cst = arith.constant dense<0.000000e+00> : vector<1x64xf32>
    %1 = vector.multi_reduction <add>, %0, %cst [2] : vector<1x64x256xf32> to vector<1x64xf32>
    %cst_2 = arith.constant 3.906250e-03 : f32
    %2 = vector.broadcast %cst_2 : f32 to vector<1x64xf32>
    %3 = arith.mulf %1, %2 : vector<1x64xf32>
    %c0_3 = arith.constant 0 : index
    %c0_4 = arith.constant 0 : index
    %4 = vector.load %arg2[%c0_3, %c0_4] : memref<4x64xf32, #tpu.memory_space<vmem>>, vector<4x64xf32>
    "tpu.trace_start"() <{level = 10 : i32, message = "bc,rc->br"}> : () -> ()
    %cst_5 = arith.constant dense<0.000000e+00> : vector<1x4xf32>
    %5 = tpu.matmul %3, %4, %cst_5 {dimension_numbers = #tpu.dot_dimension_numbers<[1], [1], [0], [0], [0, 0, 1, 0], [], []>} : vector<1x64xf32>, vector<4x64xf32>, vector<1x4xf32> -> vector<1x4xf32>
    "tpu.trace_stop"() : () -> ()
    %cst_6 = arith.constant 0.000000e+00 : f32
    %6 = vector.broadcast %cst_6 : f32 to vector<1x4xf32>
    %7 = arith.maximumf %5, %6 : vector<1x4xf32>
    %c0_7 = arith.constant 0 : index
    %c0_8 = arith.constant 0 : index
    %8 = vector.load %arg3[%c0_7, %c0_8] : memref<64x4xf32, #tpu.memory_space<vmem>>, vector<64x4xf32>
    "tpu.trace_start"() <{level = 10 : i32, message = "br,cr->bc"}> : () -> ()
    %cst_9 = arith.constant dense<0.000000e+00> : vector<1x64xf32>
    %9 = tpu.matmul %7, %8, %cst_9 {dimension_numbers = #tpu.dot_dimension_numbers<[1], [1], [0], [0], [0, 0, 1, 0], [], []>} : vector<1x4xf32>, vector<64x4xf32>, vector<1x64xf32> -> vector<1x64xf32>
    "tpu.trace_stop"() : () -> ()
    %10 = arith.negf %9 : vector<1x64xf32>
    %11 = math.exp %10 : vector<1x64xf32>
    %cst_10 = arith.constant 1.000000e+00 : f32
    %12 = vector.broadcast %cst_10 : f32 to vector<1x64xf32>
    %13 = arith.addf %12, %11 : vector<1x64xf32>
    %14 = arith.divf %12, %13 : vector<1x64xf32>
    %15 = vector.shape_cast %14 : vector<1x64xf32> to vector<1x64x1xf32>
    %c0_11 = arith.constant 0 : index
    %c0_12 = arith.constant 0 : index
    %c0_13 = arith.constant 0 : index
    %16 = vector.load %arg1[%c0_11, %c0_12, %c0_13] : memref<1x64x256xf32, #tpu.memory_space<vmem>>, vector<1x64x256xf32>
    %17 = vector.broadcast %15 : vector<1x64x1xf32> to vector<1x64x256xf32>
    %18 = arith.mulf %16, %17 : vector<1x64x256xf32>
    %c0_14 = arith.constant 0 : index
    %c0_15 = arith.constant 0 : index
    %c0_16 = arith.constant 0 : index
    %19 = vector.load %arg4[%c0_14, %c0_15, %c0_16] : memref<1x64x256xf32, #tpu.memory_space<vmem>>, vector<1x64x256xf32>
    tpu.vector_store %arg4[%c0_14, %c0_15, %c0_16], %18 {strides = array<i32>} : memref<1x64x256xf32, #tpu.memory_space<vmem>>, vector<1x64x256xf32>,
    return
  }
  func.func @transform_0(%arg0: i32) -> (i32, i32, i32) {
    %c0_i32 = arith.constant 0 : i32
    %c0_i32_0 = arith.constant 0 : i32
    %c0_i32_1 = arith.constant 0 : i32
    return %arg0, %c0_i32, %c0_i32_0 : i32, i32, i32
  }
  func.func @transform_1(%arg0: i32) -> (i32, i32) {
    %c0_i32 = arith.constant 0 : i32
    %c0_i32_0 = arith.constant 0 : i32
    %c0_i32_1 = arith.constant 0 : i32
    return %c0_i32, %c0_i32_0 : i32, i32
  }
  func.func @transform_2(%arg0: i32) -> (i32, i32) {
    %c0_i32 = arith.constant 0 : i32
    %c0_i32_0 = arith.constant 0 : i32
    %c0_i32_1 = arith.constant 0 : i32
    return %c0_i32, %c0_i32_0 : i32, i32
  }
  func.func @transform_3(%arg0: i32) -> (i32, i32, i32) {
    %c0_i32 = arith.constant 0 : i32
    %c0_i32_0 = arith.constant 0 : i32
    %c0_i32_1 = arith.constant 0 : i32
    return %arg0, %c0_i32, %c0_i32_0 : i32, i32, i32
  }
}

</mosaic_0001>

<bundles_post_ra>
// kernel: tpu_custom_call.1
= control target key start
LH: loop header
LB: loop body
LE: loop exit
PB: predicated region body
PF: predicated region fallthrough
CT: control target
= control target key end

     0   :  { %8 = vsyncpa [#allocation3], 0  ;;  %s1228_s0 = inlined_call_operand.hbm [shape: f32[2,64,256], index: 0, kind: input, shape index: {}]   ;;  %s1229_s1 = inlined_call_operand.vmem [shape: f32[4,64], index: 1, kind: input, shape index: {}]   ;;  %s1230_s2 = inlined_call_operand.vmem [shape: f32[64,4], index: 2, kind: input, shape index: {}]   ;;  %s1231_s3 = inlined_call_operand.hbm [shape: f32[2,64,256], index: 3, kind: output, shape index: {}]  }
   0x1   :  { %10 = vsyncpa [#allocation3 + $0x1], 0 }
   0x2   :  { %11 = vsyncpa [#allocation4], 0 }
   0x3   :  { %13 = vsyncpa [#allocation4 + $0x1], 0  ;;  %s923_s12 = smov 0   ;;  %s925_s13 = smov 0  }
   0x4   :  { %s927_s14 = smov 0   ;;  %s929_s15 = smov 0  }
   0x5 LB: > { %s944_s16 = sadd.s32 4294967295, %s892_s15   ;;  %s660_s17 = sadd.s32 4294967294, %s892_s15   ;;  %s892_s15 = sphi %s929_s15, %s1246_s15   ;;  %s888_s14 = sphi %s927_s14, %s1245_s14   ;;  %s884_s13 = sphi %s925_s13, %s1244_s13   ;;  %s880_s12 = sphi %s923_s12, %s1243_s12  }
   0x6   : > { %s948_s18 = sadd.s32 1, %s892_s15   ;;  %s26_s19 = sadd.s32 1, %s888_s14 }
   0x7   : > { %s23_s20 = ssub.s32 %s892_s15, %s948_s18  ;;  %p33_p0 = scmp.ne.s32.totalorder %s888_s14, %s884_s13 }
   0x8   : > { %p24_p1 = scmp.eq.s32.totalorder %s23_s20, 0  ;;  %p34_p2 = scmp.eq.s32.totalorder %s892_s15, 0 }
   0x9   : > { %p39_p3 = scmp.ne.s32.totalorder %s884_s13, %s880_s12  ;;  %p40_p4 = scmp.eq.s32.totalorder %s944_s16, 0 }
   0xa   : > { %s960_s21 = scalar_select %p24_p1, %s888_s14, %s26_s19  }
   0xb   : > { %p962_p5 = por %p34_p2, %p33_p0  ;;  %p966_p6 = por %p40_p4, %p39_p3 }
   0xc   : > { %p105_p7 = scmp.eq.s32.totalorder %s944_s16, 1  ;;  %p111_p8 = scmp.eq.s32.totalorder %s660_s17, 1 }
   0xd   : > { %p751_p10 = scmp.lt.s32.totalorder %s892_s15, 2  ;;  %s137_s26 = sand.u32 1, %s888_s14  }
   0xe   : > { %p973_p11 = por %p105_p7, %p33_p0  ;;  %p977_p12 = por %p111_p8, %p39_p3 }
   0xf   : > { %s686_s27 = sshll.u32 %s892_s15, 11  ;;  %s663_s28 = sshll.u32 %s137_s26, 7 }
  0x10   : > { %s1235_s24 = scalar_select %p973_p11, 1, 0 }
  0x11   : > { %s1236_s25 = scalar_select %p977_p12, 1, 0 }
  0x12   : > { %s986_s4 = scalar_lea.hbm %s1228_s0, %s686_s27  ;;  %s141_s5 = scalar_lea.vmem [#allocation2], %s663_s28 }
  0x13   : > { %s148_s6 = sshll.u32 %s141_s5, 4  ;;  %p990_p13 = pnand %p751_p10, %p962_p5  ;;  %s994_s6 = int_to_ptr.vmem [resolvable:$true] %s148_s6 }
  0x14   : > { %s996_s8 = scalar_lea.sflag [#allocation3], %s137_s26  ;;  %s796_s9 = scalar_lea.hbm %s986_s4, 2048 }
  0x15   : > { %p797_p0 = scmp.ne.s32.totalorder %s986_s4, %s796_s9  ;;  %p798_p1 = pneg %p990_p13 }
  0x16   : > { %s801_s17 = scalar_lea.hbm %s1228_s0, 4096  ;;  %p802_p4 = scmp.lt.u32.totalorder %s986_s4, %s1228_s0 }
  0x17   : > { %p799_p2 = pnand %p798_p1, %p797_p0  ;;  %p803_p5 = scmp.lt.u32.totalorder %s801_s17, %s796_s9 }
  0x18   : > { %p805_p8 = scmp.lt.u32.totalorder %s796_s9, %s986_s4 }
  0x19   : > { %p800_p3 = pneg %p799_p2  ;;  %p804_p7 = por %p803_p5, %p802_p4 }
  0x1b   : > { %p806_p10 = por %p805_p8, %p804_p7 }
  0x1d   : > { %p807_p9 = pnand %p806_p10, %p800_p3 }
  0x1f   : > { %810 = shalt.err (!%p807_p9)
}
  0x20   : > { %s811_s22 = scalar_lea.vmem %s994_s6, 2048  ;;  %s894_s26 = smov [#allocation2]  }
  0x21   : > { %p812_p0 = scmp.ne.s32.totalorder %s994_s6, %s811_s22  ;;  %s816_s27 = sshll.u32 %s894_s26, 4  ;;  %s817_s27 = int_to_ptr.vmem [resolvable:$false] %s816_s27 }
  0x22   : > { %s818_s28 = scalar_lea.vmem %s817_s27, 4096  ;;  %p819_p11 = scmp.lt.s32.totalorder %s994_s6, %s817_s27 }
  0x23   : > { %p814_p2 = pnand %p812_p0, %p798_p1  ;;  %p820_p4 = scmp.lt.s32.totalorder %s818_s28, %s811_s22 }
  0x25   : > { %p815_p12 = pneg %p814_p2  ;;  %p821_p5 = por %p820_p4, %p819_p11 }
  0x27   : > { %p822_p7 = pnand %p821_p5, %p815_p12 }
  0x29   : > { %825 = shalt.err (!%p822_p7)
}
  0x2a   : > { %s895_s29 = smov 256   ;;  %s896_s30 = smov 16  }
  0x2b   : > { %746 = dma.hbm_to_vmem [thread:$0]  (!%p990_p13), %s986_s4, 2048, %s994_s6, %s996_s8, %s895_s29, %s895_s29, %s896_s30  }
  0x2c   : > { %p666_p9 = scmp.ge.s32.totalorder %s892_s15, 1  ;;  %p156_p1 = scmp.lt.s32.totalorder %s892_s15, 3 }
  0x2e   : > { %p157_p3 = pnand %p666_p9, %p156_p1 }
  0x2f   : > { %s1027_s5 = sand.u32 (!%p157_p3), 1, %s884_s13  }
  0x30   : > { %160 = sbr.rel (%p157_p3) target bundleno = 821 (0x335), region = 32  ;;  %s667_s9 = sshll.u32 (!%p157_p3), %s1027_s5, 7 }
  0x31   : > { %s163_s10 = scalar_lea.sflag (!%p157_p3), [#allocation3], %s1027_s5  ;;  %s166_s11 = scalar_lea.vmem (!%p157_p3), [#allocation2], %s667_s9 }
  0x37   : > { %871 = dma.done.wait (%p966_p6), %s163_s10, 2048  }
  0x38   : > { %873 = vsyncadd (%p966_p6), %s163_s10, 4294965248  ;;  %v1037_v0 = vld [vmem:[%s166_s11] sm:$0xff]  ;;  %v1039_v1 = vld [vmem:[%s166_s11 + $0x8] sm:$0xff]  ;;  %v897_v24 = vmov 0.0   ;;  %vm301_vm0 = vcmask 523264   ;;  %vm898_vm1 = vmmov 0   ;;  %v246_v40 = vlaneseq }
  0x39   : > { %v1041_v2 = vld [vmem:[%s166_s11 + $0x20] sm:$0xff]  ;;  %v205_v3 = vadd.f32 %v1039_v1, %v1037_v0  ;;  %v1045_v4 = vld [vmem:[%s166_s11 + $0x28] sm:$0xff]  ;;  %v1047_v5 = vld [vmem:[%s166_s11 + $0x10] sm:$0xff]  ;;  %699 = vmatprep.subr.mxu0 %v897_v24  ;;  %701 = vmatprep.mubr.msk.f32.mxu0 %vm898_vm1, %v897_v24  ;;  %vm386_vm2 = vcmask 31744   ;;  %v899_v28 = vmov 0.0|0.0   ;;  %vm257_vm4 = vcmask 130112  }
  0x3a   : > { %v1049_v6 = vld [vmem:[%s166_s11 + $0x18] sm:$0xff]  ;;  %v211_v7 = vadd.f32 %v1045_v4, %v1041_v2  ;;  %v1053_v8 = vld [vmem:[%s166_s11 + $0x30] sm:$0xff]  ;;  %v1061_v12 = vld [vmem:[%s166_s11 + $0x40] sm:$0xff]  ;;  %720 = vmatprep.mubr.msk.f32.mxu1 %vm898_vm1, %v897_v24  ;;  %723 = vmatprep.subr.bf16.mxu1 %v899_v28  ;;  %v247_v41 = vand.u32 127, %v246_v40  ;;  %v1127_v42 = vshrl.u32 %v246_v40, 7  ;;  %vm264_vm5 = vcmask 195712  }
  0x3b   : > { %v1055_v9 = vld [vmem:[%s166_s11 + $0x38] sm:$0xff]  ;;  %206 = vadd.xlane.f32.xlu0 %v205_v3  ;;  %v208_v10 = vadd.f32 %v1049_v6, %v1047_v5  ;;  %v1063_v13 = vld [vmem:[%s166_s11 + $0x48] sm:$0xff]  ;;  %v1065_v14 = vld [vmem:[%s166_s11 + $0x50] sm:$0xff]  ;;  %vm271_vm6 = vcmask 261312   ;;  %vm278_vm7 = vcmask 326912   ;;  %vm285_vm8 = vcmask 392512  }
  0x3c   : > { %212 = vadd.xlane.f32.xlu1 %v211_v7  ;;  %v214_v11 = vadd.f32 %v1055_v9, %v1053_v8  ;;  %v1067_v15 = vld [vmem:[%s166_s11 + $0x58] sm:$0xff]  ;;  %v217_v16 = vadd.f32 %v1063_v13, %v1061_v12  ;;  %v1073_v18 = vld [vmem:[%s166_s11 + $0x60] sm:$0xff]  ;;  %v1075_v19 = vld [vmem:[%s166_s11 + $0x68] sm:$0xff]  ;;  %v252_v43 = vadd.s32 4294967288, %v247_v41  ;;  %v259_v45 = vadd.s32 4294967280, %v247_v41  ;;  %s1147_s6 = scalar_lea.vmem [#allocation5], %s667_s9 }
  0x3d   : > { %v220_v17 = vadd.f32 %v1067_v15, %v1065_v14  ;;  %v1077_v20 = vld [vmem:[%s166_s11 + $0x70] sm:$0xff]  ;;  %v1079_v21 = vld [vmem:[%s166_s11 + $0x78] sm:$0xff]  ;;  %v223_v22 = vadd.f32 %v1075_v19, %v1073_v18  ;;  %v237_v25 = vld [vmem:[%s1229_s1] sm:$0xf]  ;;  %v266_v46 = vadd.s32 4294967272, %v247_v41  ;;  %v250_v48 = vsub.s32 %v247_v41, %v1127_v42  ;;  %s687_s9 = sshll.u32 %s944_s16, 11 }
  0x3e   : > { %v226_v23 = vadd.f32 %v1079_v21, %v1077_v20  ;;  %700 = vmatpush3.xpose.msk.msra.mxu0 %vm301_vm0, %v237_v25  ;;  %v378_v26 = vld [vmem:[%s1230_s2] sm:$0xff]  ;;  %v379_v27 = vld [vmem:[%s1230_s2 + $0x8] sm:$0xff]  ;;  %vm1097_vm3 = vmpackc.low %vm386_vm2, %vm386_vm2  ;;  %v255_v50 = vsub.s32 %v252_v43, %v1127_v42  ;;  %v273_v51 = vadd.s32 4294967264, %v247_v41  ;;  %v262_v52 = vsub.s32 %v259_v45, %v1127_v42  ;;  %s587_s7 = sshll.u32 %s1147_s6, 4  ;;  %s1178_s19 = scalar_lea.hbm %s1231_s3, %s687_s9  ;;  %s1180_s7 = int_to_ptr.vmem [resolvable:$true] %s587_s7 }
  0x3f   : > { %209 = vadd.xlane.f32.xlu0 %v208_v10  ;;  %v724_v29 = vpack.c.bf16 %v379_v27, %v378_v26  ;;  %v380_v31 = vld [vmem:[%s1230_s2 + $0x10] sm:$0xff]  ;;  %v381_v32 = vld [vmem:[%s1230_s2 + $0x18] sm:$0xff]  ;;  %v382_v34 = vld [vmem:[%s1230_s2 + $0x20] sm:$0xff]  ;;  %v269_v55 = vsub.s32 %v266_v46, %v1127_v42  ;;  %v280_v56 = vadd.s32 4294967256, %v247_v41  ;;  %v287_v63 = vadd.s32 4294967248, %v247_v41  ;;  %s574_s16 = scalar_lea.sflag [#allocation4], %s1027_s5 }
  0x40   : > { %215 = vadd.xlane.f32.xlu1 %v214_v11  ;;  %v728_v33 = vpack.c.bf16 %v381_v32, %v380_v31  ;;  %v383_v35 = vld [vmem:[%s1230_s2 + $0x28] sm:$0xff]  ;;  %v384_v37 = vld [vmem:[%s1230_s2 + $0x30] sm:$0xff]  ;;  %v385_v38 = vld [vmem:[%s1230_s2 + $0x38] sm:$0xff]  ;;  %v276_v62 = vsub.s32 %v273_v51, %v1127_v42  ;;  %vm292_vm9 = vcmask 458112   ;;  %vm299_vm10 = vcmask 523712   ;;  %s826_s20 = scalar_lea.vmem %s1180_s7, 2048 }
  0x41   : > { %726 = vmatpush3.bf16.xpose.msk.msra.mxu1 %vm1097_vm3, %v724_v29  ;;  %v732_v36 = vpack.c.bf16 %v383_v35, %v382_v34  ;;  %v736_v39 = vpack.c.bf16 %v385_v38, %v384_v37  ;;  %v283_v11 = vsub.s32 %v280_v56, %v1127_v42  ;;  %p827_p6 = scmp.ne.s32.totalorder %s1180_s7, %s826_s20  ;;  %p1240_p11 = scmp.ne.s32.totalorder %s1235_s24, 0 }
  0x42   : > { %727 = vmatprep.subr.bf16.mxu1 %v899_v28  ;;  %s900_s22 = smov [#allocation5]  }
  0x43   : > { %218 = vadd.xlane.f32.xlu0 %v217_v16  ;;  %v294_v16 = vadd.s32 4294967240, %v247_v41  ;;  %p828_p12 = pnand %p827_p6, %p1240_p11  ;;  %s830_s26 = sshll.u32 %s900_s22, 4  ;;  %s831_s26 = int_to_ptr.vmem [resolvable:$false] %s830_s26 }
  0x44   : > { %221 = vadd.xlane.f32.xlu1 %v220_v17  ;;  %s832_s27 = scalar_lea.vmem %s831_s26, 4096  ;;  %p833_p8 = scmp.lt.s32.totalorder %s1180_s7, %s831_s26 }
  0x45   : > { %v297_v31 = vsub.s32 %v294_v16, %v1127_v42  ;;  %p829_p13 = pneg %p828_p12  ;;  %p834_p10 = scmp.lt.s32.totalorder %s832_s27, %s826_s20 }
  0x47   : > { %224 = vadd.xlane.f32.xlu0 %v223_v22  ;;  %p835_p0 = por %p834_p10, %p833_p8 }
  0x48   : > { %227 = vadd.xlane.f32.xlu1 %v226_v23 }
  0x49   : > { %730 = vmatpush3.bf16.xpose.msk.msra.mxu1 %vm1097_vm3, %v728_v33  ;;  %p836_p2 = pnand %p835_p0, %p829_p13 }
  0x4a   : > { %731 = vmatprep.subr.bf16.mxu1 %v899_v28 }
  0x51   : > { %734 = vmatpush3.bf16.xpose.msk.msra.mxu1 %vm1097_vm3, %v732_v36 }
  0x52   : > { %735 = vmatprep.subr.bf16.mxu1 %v899_v28  ;;  %v290_v28 = vsub.s32 %v287_v63, %v1127_v42 }
  0x59   : > { %738 = vmatpush3.bf16.xpose.msk.msra.mxu1 %vm1097_vm3, %v736_v39 }
  0xc8   : > { %v207_v44 = vpop.xlane.xlu0 %206 }
  0xc9   : > { %v213_v47 = vpop.xlane.xlu1 %212  ;;  %v229_v49 = vmul.f32 0.00390625, %v207_v44 }
  0xca   : > { %v231_v53 = vmul.f32 0.00390625, %v213_v47 }
  0xcb   : > { %v251_v60 = vrot.slane %v229_v49, %v250_v48 }
  0xcc   : > { %v210_v54 = vpop.xlane.xlu0 %209  ;;  %v263_v3 = vrot.slane %v231_v53, %v262_v52 }
  0xcd   : > { %v230_v57 = vmul.f32 0.00390625, %v210_v54  ;;  %v216_v58 = vpop.xlane.xlu1 %215 }
  0xce   : > { %v232_v59 = vmul.f32 0.00390625, %v216_v58 }
  0xcf   : > { %v256_v61 = vrot.slane %v230_v57, %v255_v50  ;;  %v492_v50 = vsub.s32 0, %v1127_v42 }
  0xd0   : > { %v270_v7 = vrot.slane %v232_v59, %v269_v55  ;;  %v219_v10 = vpop.xlane.xlu0 %218 }
  0xd1   : > { %v258_v17 = vsel %vm257_vm4, %v256_v61, %v251_v60  ;;  %v233_v22 = vmul.f32 0.00390625, %v219_v10  ;;  %v222_v23 = vpop.xlane.xlu1 %221 }
  0xd2   : > { %v265_v24 = vsel %vm264_vm5, %v263_v3, %v258_v17  ;;  %v234_v25 = vmul.f32 0.00390625, %v222_v23 }
  0xd3   : > { %v272_v26 = vsel %vm271_vm6, %v270_v7, %v265_v24  ;;  %v277_v27 = vrot.slane %v233_v22, %v276_v62 }
  0xd4   : > { %v284_v29 = vrot.slane %v234_v25, %v283_v11  ;;  %v225_v30 = vpop.xlane.xlu0 %224 }
  0xd5   : > { %v279_v32 = vsel %vm278_vm7, %v277_v27, %v272_v26  ;;  %v235_v33 = vmul.f32 0.00390625, %v225_v30  ;;  %v228_v34 = vpop.xlane.xlu1 %227 }
  0xd6   : > { %v236_v35 = vmul.f32 0.00390625, %v228_v34  ;;  %v286_v37 = vsel %vm285_vm8, %v284_v29, %v279_v32 }
  0xd7   : > { %v291_v36 = vrot.slane %v235_v33, %v290_v28 }
  0xd8   : > { %v298_v38 = vrot.slane %v236_v35, %v297_v31 }
  0xd9   : > { %v293_v39 = vsel %vm292_vm9, %v291_v36, %v286_v37 }
  0xda   : > { %v300_v40 = vsel %vm299_vm10, %v298_v38, %v293_v39 }
  0xdb   : > { %702 = vmatmul.mubr.msk.f32.vlgmr.msra.gmra.mrb[0].mxu0 %vm301_vm0, %v300_v40 }
 0x1ae   : > { %v373_v41 = vpop.f32.mrb[0].mxu0 }
 0x1af   : > { %v377_v43 = vmax.f32 %v373_v41, 0.0  ;;  %v703_v44 = vpop.f32.mrb[1].mxu0 }
 0x1b1   : > { %721 = vmatmul.mubr.msk.f32.vlgmr.msra.gmra.mrb[0].mxu1 %vm386_vm2, %v377_v43 }
 0x284   : > { %v480_v45 = vpop.f32.mrb[0].mxu1 }
 0x285   : > { %v680_v46 = vmul.f32 -1.442695, %v480_v45  ;;  %v722_v47 = vpop.f32.mrb[1].mxu1 }
 0x287   : > { %792 = vpow2.f32 %v680_v46 }
 0x291   : > { %v793_v48 = vpop.eup %792 }
 0x292   : > { %v487_v49 = vadd.f32 1.0, %v793_v48 }
 0x294   : > { %794 = vrcp.f32 %v487_v49 }
 0x29e   : > { %v795_v51 = vpop.eup %794 }
 0x29f   : > { %v493_v52 = vrot.slane %v795_v51, %v492_v50 }
 0x2a1   : > { %499 = vbcast.lane.b32.xlu1 %v493_v52, 264  ;;  %495 = vbcast.lane.b32.xlu0 %v493_v52, 256 }
 0x2a5   : > { %503 = vbcast.lane.b32.xlu1 %v493_v52, 272  ;;  %511 = vbcast.lane.b32.xlu0 %v493_v52, 288 }
 0x2a9   : > { %507 = vbcast.lane.b32.xlu1 %v493_v52, 280  ;;  %519 = vbcast.lane.b32.xlu0 %v493_v52, 304 }
 0x2ad   : > { %515 = vbcast.lane.b32.xlu1 %v493_v52, 296 }
 0x2b1   : > { %523 = vbcast.lane.b32.xlu1 %v493_v52, 312 }
 0x313   : > { %v500_v53 = vpop.permute.xlu1 %499  ;;  %v496_v54 = vpop.permute.xlu0 %495 }
 0x314   : > { %v543_v55 = vmul.f32 %v500_v53, %v1047_v5  ;;  %v544_v56 = vmul.f32 %v500_v53, %v1049_v6  ;;  %v541_v57 = vmul.f32 %v496_v54, %v1037_v0  ;;  %v542_v42 = vmul.f32 %v496_v54, %v1039_v1 }
 0x316   : > { %559 = vst [vmem:[%s1147_s6 + $0x10] sm:$0xff] %v543_v55  ;;  %560 = vst [vmem:[%s1147_s6 + $0x18] sm:$0xff] %v544_v56 }
 0x317   : > { %557 = vst [vmem:[%s1147_s6] sm:$0xff] %v541_v57  ;;  %558 = vst [vmem:[%s1147_s6 + $0x8] sm:$0xff] %v542_v42  ;;  %v504_v5 = vpop.permute.xlu1 %503  ;;  %v512_v0 = vpop.permute.xlu0 %511 }
 0x318   : > { %v545_v1 = vmul.f32 %v504_v5, %v1041_v2  ;;  %v546_v6 = vmul.f32 %v504_v5, %v1045_v4  ;;  %v549_v58 = vmul.f32 %v512_v0, %v1061_v12  ;;  %v550_v59 = vmul.f32 %v512_v0, %v1063_v13 }
 0x31a   : > { %561 = vst [vmem:[%s1147_s6 + $0x20] sm:$0xff] %v545_v1  ;;  %562 = vst [vmem:[%s1147_s6 + $0x28] sm:$0xff] %v546_v6 }
 0x31b   : > { %565 = vst [vmem:[%s1147_s6 + $0x40] sm:$0xff] %v549_v58  ;;  %566 = vst [vmem:[%s1147_s6 + $0x48] sm:$0xff] %v550_v59  ;;  %v508_v60 = vpop.permute.xlu1 %507  ;;  %v520_v61 = vpop.permute.xlu0 %519 }
 0x31c   : > { %v547_v2 = vmul.f32 %v508_v60, %v1053_v8  ;;  %v548_v62 = vmul.f32 %v508_v60, %v1055_v9  ;;  %v553_v4 = vmul.f32 %v520_v61, %v1073_v18  ;;  %v554_v12 = vmul.f32 %v520_v61, %v1075_v19 }
 0x31e   : > { %563 = vst [vmem:[%s1147_s6 + $0x30] sm:$0xff] %v547_v2  ;;  %564 = vst [vmem:[%s1147_s6 + $0x38] sm:$0xff] %v548_v62 }
 0x31f   : > { %569 = vst [vmem:[%s1147_s6 + $0x60] sm:$0xff] %v553_v4  ;;  %570 = vst [vmem:[%s1147_s6 + $0x68] sm:$0xff] %v554_v12  ;;  %v516_v13 = vpop.permute.xlu1 %515 }
 0x320   : > { %v551_v63 = vmul.f32 %v516_v13, %v1065_v14  ;;  %v552_v3 = vmul.f32 %v516_v13, %v1067_v15 }
 0x322   : > { %567 = vst [vmem:[%s1147_s6 + $0x50] sm:$0xff] %v551_v63  ;;  %568 = vst [vmem:[%s1147_s6 + $0x58] sm:$0xff] %v552_v3 }
 0x323   : > { %v524_v8 = vpop.permute.xlu1 %523 }
 0x324   : > { %v555_v9 = vmul.f32 %v524_v8, %v1077_v20  ;;  %v556_v14 = vmul.f32 %v524_v8, %v1079_v21 }
 0x326   : > { %571 = vst [vmem:[%s1147_s6 + $0x70] sm:$0xff] %v555_v9  ;;  %572 = vst [vmem:[%s1147_s6 + $0x78] sm:$0xff] %v556_v14 }
 0x327   : > { %839 = shalt.err (!%p836_p2)
}
 0x328   : > { %s840_s28 = scalar_lea.hbm %s1178_s19, 2048  ;;  %s844_s10 = scalar_lea.hbm %s1231_s3, 4096 }
 0x329   : > { %p841_p4 = scmp.ne.s32.totalorder %s1178_s19, %s840_s28  ;;  %p845_p9 = scmp.lt.u32.totalorder %s1178_s19, %s1231_s3 }
 0x32a   : > { %p846_p1 = scmp.lt.u32.totalorder %s844_s10, %s840_s28  ;;  %p848_p6 = scmp.lt.u32.totalorder %s840_s28, %s1178_s19 }
 0x32b   : > { %p842_p5 = pnand %p841_p4, %p1240_p11 }
 0x32c   : > { %p847_p3 = por %p846_p1, %p845_p9 }
 0x32d   : > { %p843_p7 = pneg %p842_p5 }
 0x32e   : > { %p849_p12 = por %p848_p6, %p847_p3 }
 0x330   : > { %p850_p13 = pnand %p849_p12, %p843_p7 }
 0x332   : > { %853 = shalt.err (!%p850_p13)
}
 0x333   : > { %s901_s4 = smov 256   ;;  %s902_s6 = smov 16  }
 0x334   : > { %741 = dma.vmem_to_hbm [thread:$0]  (%p1240_p11), %s1180_s7, 2048, %s1178_s19, %s574_s16, %s901_s4, %s901_s4, %s902_s6  }
 0x335 PF: > { %s602_s9 = sand.u32 1, %s880_s12   ;;  %p1241_p8 = scmp.ne.s32.totalorder %s1236_s25, 0 }
 0x336   : > { %p1242_p10 = scmp.ge.s32.totalorder %s892_s15, 2  ;;  %s603_s8 = scalar_lea.sflag [#allocation4], %s602_s9 }
 0x338   : > { %p748_p0 = pnand %p1242_p10, %p1241_p8 }
 0x33a   : > { %875 = dma.done.wait (!%p748_p0), %s603_s8, 2048  }
 0x33b   : > { %877 = vsyncadd (!%p748_p0), %s603_s8, 4294965248  ;;  %p16_p2 = scmp.ge.s32.totalorder %s948_s18, 4   ;;  %s1243_s12 = smov %s884_s13 }
 0x33c   : > { %s1244_s13 = smov %s888_s14  ;;  %s1245_s14 = smov %s960_s21 }
 0x33d   : > { %s1246_s15 = smov %s948_s18  ;;  %18 = sbr.rel (!%p16_p2) target bundleno = 5 (0x5), region = 77 }
 0x344   :  { %608 = vsyncpa [#allocation3], 1 }
 0x345   :  { %610 = vsyncpa [#allocation3 + $0x1], 1 }
 0x346   :  { %611 = vsyncpa [#allocation4], 1 }
 0x347   :  { %613 = vsyncpa [#allocation4 + $0x1], 1 }

</bundles_post_ra>
